<compile_context>
chip_gen: v6e
topology: v6e:2x2x1
jax: 0.10.0
libtpu: 0.0.40
codegen_flags: <defaults>
</compile_context>

<pallas_src>
import math
import numpy as np

import jax
import jax.numpy as jnp
from jax.experimental import pallas as pl
from jax.experimental.pallas import tpu as pltpu


# MXU operand dtype (f32 accumulate). bf16 is native-rate on v5e/v6e/v7x.
_MATMUL_DTYPE = jnp.bfloat16


# ----------------------------------------------------------------------------
# Deterministic "parameters": the Gaussian window (same as create_window()).
# ----------------------------------------------------------------------------
def gaussian_1d(window_size: int, sigma: float) -> np.ndarray:
    g = np.array(
        [math.exp(-((x - window_size // 2) ** 2) / float(2 * sigma ** 2))
         for x in range(window_size)],
        dtype=np.float64,
    )
    return (g / g.sum()).astype(np.float32)


def band_matrices(H: int, W: int, g: np.ndarray):
    """Banded matrices implementing zero-padded 'same' 1-D conv with g.

    conv along W:  out = x @ Mw     (Mw[k, i] = g[k - i + pad])
    conv along H:  out = Mh @ x     (Mh[i, k] = g[k - i + pad])
    """
    ws = len(g)
    pad = ws // 2

    def right_mat(n):
        k = np.arange(n)[:, None]
        i = np.arange(n)[None, :]
        d = k - i + pad
        ok = (d >= 0) & (d < ws)
        return np.where(ok, g[np.clip(d, 0, ws - 1)], 0.0).astype(np.float32)

    mw = right_mat(W)                          # (W, W)  right-multiply
    mh = np.ascontiguousarray(right_mat(H).T)  # (H, H)  left-multiply
    return mh, mw


# ----------------------------------------------------------------------------
# Pallas kernel: B lane-packed channels per grid step -> per-channel SSIM sums.
#   x1_ref/x2_ref : (1, H, B*W)   raw-dtype image block (cast in-kernel)
#   mh_ref        : (H, H)        H-conv band matrix        (bf16)
#   mwbd_ref      : (BW, BW)      block-diag W-conv band    (bf16)
#   sel_ref       : (BW, B)       lane-block -> channel selector (f32)
#   out_ref       : (1, 1, B)     per-channel SSIM sums
# ----------------------------------------------------------------------------
def _ssim_kernel(x1_ref, x2_ref, mh_ref, mwbd_ref, sel_ref, out_ref):
    f32 = jnp.float32
    _, H, BW = x1_ref.shape
    B = out_ref.shape[-1]

    # Cast in-kernel (VPU) instead of in HBM.
    x1 = x1_ref[0].astype(f32)
    x2 = x2_ref[0].astype(f32)

    # Five SSIM maps stacked along the sublane axis -> (5H, BW).
    m0 = jnp.concatenate([x1, x2, x1 * x1, x2 * x2, x1 * x2], axis=0)

    # Fused W-conv: ONE (5H, BW) @ (BW, BW) MXU matmul for all maps/channels.
    wc = jnp.dot(m0.astype(_MATMUL_DTYPE), mwbd_ref[...],
                 preferred_element_type=f32)

    # Re-lay the five maps side-by-side along lanes -> (H, 5*BW), then the
    # fused H-conv: ONE (H, H) @ (H, 5*BW) MXU matmul.
    hcin = jnp.concatenate([wc[i * H:(i + 1) * H, :] for i in range(5)], axis=1)
    hc = jnp.dot(mh_ref[...], hcin.astype(_MATMUL_DTYPE),
                 preferred_element_type=f32)

    mu1 = hc[:, 0 * BW:1 * BW]
    mu2 = hc[:, 1 * BW:2 * BW]
    e11 = hc[:, 2 * BW:3 * BW]
    e22 = hc[:, 3 * BW:4 * BW]
    e12 = hc[:, 4 * BW:5 * BW]

    # Elementwise SSIM math once over the whole (H, B*W) block, all in f32.
    mu1_sq = mu1 * mu1
    mu2_sq = mu2 * mu2
    mu1_mu2 = mu1 * mu2
    sigma1_sq = e11 - mu1_sq
    sigma2_sq = e22 - mu2_sq
    sigma12 = e12 - mu1_mu2

    C1 = 0.01 ** 2
    C2 = 0.03 ** 2
    num = (2.0 * mu1_mu2 + C1) * (2.0 * sigma12 + C2)
    den = (mu1_sq + mu2_sq + C1) * (sigma1_sq + sigma2_sq + C2)
    inv = pl.reciprocal(den, approx=True)      # EUP slot
    inv = inv * (2.0 - den * inv)              # one Newton step (cheap, VPU)
    ssim_map = num * inv                       # (H, B*W)

    # Per-channel sums: sublane-reduce over H, then a tiny selector matmul
    # collapses each W-wide lane block to its channel. Single lane-dense write.
    col = jnp.sum(ssim_map, axis=0, keepdims=True)          # (1, BW)
    chan = jnp.dot(col, sel_ref[...], preferred_element_type=f32)  # (1, B)
    out_ref[...] = chan.reshape(1, 1, B)


# ----------------------------------------------------------------------------
# Generation-aware sizing.
# ----------------------------------------------------------------------------
def _vmem_capacity_bytes() -> int:
    try:
        info = pltpu.get_tpu_info()
        cap = getattr(info, "vmem_capacity_bytes", None)
        if cap:
            return int(cap)
    except Exception:
        pass
    return 64 * 1024 * 1024   # conservative (v7x per-TC)


def _pick_channels_per_step(nc: int, h: int, w: int,
                            in_bytes: int, vmem_budget: int) -> int:
    """Channels packed per grid step (must divide N*C)."""
    max_lanes = 256            # fill the MXU N dim; beyond this block-diag waste grows
    candidates = []
    for b in range(1, nc + 1):
        if nc % b:
            continue
        bw = b * w
        if b > 1 and bw > max_lanes:
            continue
        need = (2 * 2 * h * bw * in_bytes          # double-buffered input blocks (x2 imgs)
                + 22 * h * bw * 4                  # live f32 working set in the kernel
                + (bw * bw + h * h) * 2            # bf16 band matrices
                + bw * b * 4)                      # f32 selector
        if need <= vmem_budget:
            candidates.append(b)
    if not candidates:
        # TODO(synk): fall back to H-strip tiling for huge images instead of B=1.
        return 1
    # Prefer lane-dense blocks (B*W >= 128), then >=2 grid steps (v7x 2 TCs),
    # then the largest B (fewer per-step overheads).
    return max(candidates, key=lambda b: (b * w >= 128, nc // b >= 2, b))


# ----------------------------------------------------------------------------
# Wrapper (matches SSIM(window_size=11, size_average=True).forward(img1, img2))
# ----------------------------------------------------------------------------
def ssim(img1, img2, window_size: int = 11, size_average: bool = True):
    assert img1.shape == img2.shape and img1.ndim == 4
    N, C, H, W = img1.shape
    NC = N * C

    vmem_cap = _vmem_capacity_bytes()
    vmem_limit = min(int(vmem_cap * 0.85), 110 * 1024 * 1024)
    in_bytes = jnp.dtype(img1.dtype).itemsize
    B = _pick_channels_per_step(NC, H, W, in_bytes, int(vmem_limit * 0.7))
    G = NC // B
    BW = B * W

    # Compile-time band matrices (zero-padded 'same' Gaussian conv).
    g = gaussian_1d(window_size, 1.5)
    mh_np, mw_np = band_matrices(H, W, g)
    mwbd_np = np.kron(np.eye(B, dtype=np.float32), mw_np)                 # (BW, BW)
    sel_np = np.kron(np.eye(B, dtype=np.float32),
                     np.ones((W, 1), dtype=np.float32))                   # (BW, B)

    mh = jnp.asarray(mh_np, dtype=_MATMUL_DTYPE)
    mwbd = jnp.asarray(mwbd_np, dtype=_MATMUL_DTYPE)
    sel = jnp.asarray(sel_np, dtype=jnp.float32)

    # Lane-pack B channels per block: (N,C,H,W) -> (G, H, B*W).
    # No pad / no cast in HBM (cast happens in-kernel).
    def pack(x):
        return x.reshape(G, B, H, W).transpose(0, 2, 1, 3).reshape(G, H, BW)

    x1 = pack(img1)
    x2 = pack(img2)

    chan_sums = pl.pallas_call(
        _ssim_kernel,
        out_shape=jax.ShapeDtypeStruct((G, 1, B), jnp.float32),
        grid=(G,),
        in_specs=[
            pl.BlockSpec((1, H, BW), lambda i: (i, 0, 0)),
            pl.BlockSpec((1, H, BW), lambda i: (i, 0, 0)),
            pl.BlockSpec((H, H), lambda i: (0, 0)),
            pl.BlockSpec((BW, BW), lambda i: (0, 0)),
            pl.BlockSpec((BW, B), lambda i: (0, 0)),
        ],
        out_specs=pl.BlockSpec((1, 1, B), lambda i: (i, 0, 0)),
        compiler_params=pltpu.CompilerParams(
            dimension_semantics=("parallel",),
            vmem_limit_bytes=vmem_limit,
        ),
    )(x1, x2, mh, mwbd, sel)

    chan_means = chan_sums.reshape(N, C) / float(H * W)
    if size_average:
        return chan_means.mean()
    # torch: .mean(1).mean(1).mean(1) -> shape (N,)
    return chan_means.mean(axis=1)


# ----------------------------------------------------------------------------
# Pure-JAX reference (padded separable conv, independent of the kernel path).
# ----------------------------------------------------------------------------
def _ssim_reference(img1, img2, window_size: int = 11, size_average: bool = True):
    N, C, H, W = img1.shape
    pad = window_size // 2
    g = jnp.asarray(gaussian_1d(window_size, 1.5))

    def gconv(x):
        xp = jnp.pad(x, ((0, 0), (0, 0), (pad, pad), (pad, pad)))
        h = sum(g[j] * xp[:, :, :, j:j + W] for j in range(window_size))
        v = sum(g[i] * h[:, :, i:i + H, :] for i in range(window_size))
        return v

    x1 = img1.astype(jnp.float32)
    x2 = img2.astype(jnp.float32)
    mu1, mu2 = gconv(x1), gconv(x2)
    mu1_sq, mu2_sq, mu1_mu2 = mu1 * mu1, mu2 * mu2, mu1 * mu2
    sigma1_sq = gconv(x1 * x1) - mu1_sq
    sigma2_sq = gconv(x2 * x2) - mu2_sq
    sigma12 = gconv(x1 * x2) - mu1_mu2
    C1, C2 = 0.01 ** 2, 0.03 ** 2
    ssim_map = ((2 * mu1_mu2 + C1) * (2 * sigma12 + C2)) / (
        (mu1_sq + mu2_sq + C1) * (sigma1_sq + sigma2_sq + C2))
    if size_average:
        return ssim_map.mean()
    return ssim_map.mean(axis=(1, 2, 3))


if __name__ == "__main__":
    key = jax.random.PRNGKey(0)
    k1, k2 = jax.random.split(key)
    img1 = jax.random.uniform(k1, (2, 4, 16, 16), dtype=jnp.float32)
    img2 = jax.random.uniform(k2, (2, 4, 16, 16), dtype=jnp.float32)

    out = jax.block_until_ready(ssim(img1, img2, window_size=11, size_average=True))
    ref = _ssim_reference(img1, img2, 11, True)
    assert out.shape == () and bool(jnp.isfinite(out))
    assert abs(float(out) - float(ref)) < 1e-2

    out_n = jax.block_until_ready(ssim(img1, img2, window_size=11, size_average=False))
    ref_n = _ssim_reference(img1, img2, 11, False)
    assert out_n.shape == (2,)
    assert bool(jnp.all(jnp.abs(out_n - ref_n) < 1e-2))

    print("KERNEL_OK")
</pallas_src>

<mosaic_0001>
module attributes {stable_mosaic.version = 11 : i64} {
  func.func @_ssim_kernel(%arg0: i32, %arg1: memref<1x16x128xf32, #tpu.memory_space<vmem>>, %arg2: memref<1x16x128xf32, #tpu.memory_space<vmem>>, %arg3: memref<16x16xbf16, #tpu.memory_space<vmem>>, %arg4: memref<128x128xbf16, #tpu.memory_space<vmem>>, %arg5: memref<128x8xf32, #tpu.memory_space<vmem>>, %arg6: memref<1x1x8xf32, #tpu.memory_space<vmem>>) attributes {dimension_semantics = [#tpu.dimension_semantics<parallel>], iteration_bounds = array<i64: 1>, scalar_prefetch = 0 : i64, scratch_operands = 0 : i64, tpu.core_type = #tpu.core_type<tc>, window_params = [{transform_indices = @transform_0, window_bounds = array<i64: 1, 16, 128>}, {transform_indices = @transform_1, window_bounds = array<i64: 1, 16, 128>}, {pipeline_mode = #tpu.pipeline_mode<synchronous>, transform_indices = @transform_2, window_bounds = array<i64: 16, 16>}, {pipeline_mode = #tpu.pipeline_mode<synchronous>, transform_indices = @transform_3, window_bounds = array<i64: 128, 128>}, {pipeline_mode = #tpu.pipeline_mode<synchronous>, transform_indices = @transform_4, window_bounds = array<i64: 128, 8>}, {transform_indices = @transform_5, window_bounds = array<i64: 1, 1, 8>}]} {
    %c0 = arith.constant 0 : index
    %c0_0 = arith.constant 0 : index
    %c0_1 = arith.constant 0 : index
    %0 = vector.load %arg1[%c0, %c0_0, %c0_1] : memref<1x16x128xf32, #tpu.memory_space<vmem>>, vector<1x16x128xf32>
    %1 = vector.shape_cast %0 : vector<1x16x128xf32> to vector<16x128xf32>
    %c0_2 = arith.constant 0 : index
    %c0_3 = arith.constant 0 : index
    %c0_4 = arith.constant 0 : index
    %2 = vector.load %arg2[%c0_2, %c0_3, %c0_4] : memref<1x16x128xf32, #tpu.memory_space<vmem>>, vector<1x16x128xf32>
    %3 = vector.shape_cast %2 : vector<1x16x128xf32> to vector<16x128xf32>
    %4 = arith.mulf %1, %1 : vector<16x128xf32>
    %5 = arith.mulf %3, %3 : vector<16x128xf32>
    %6 = arith.mulf %1, %3 : vector<16x128xf32>
    %7 = tpu.concatenate %1, %3, %4, %5, %6 in 0 : vector<16x128xf32>, vector<16x128xf32>, vector<16x128xf32>, vector<16x128xf32>, vector<16x128xf32> -> vector<80x128xf32>
    %8 = arith.truncf %7 : vector<80x128xf32> to vector<80x128xbf16>
    %c0_5 = arith.constant 0 : index
    %c0_6 = arith.constant 0 : index
    %9 = vector.load %arg4[%c0_5, %c0_6] : memref<128x128xbf16, #tpu.memory_space<vmem>>, vector<128x128xbf16>
    %cst = arith.constant dense<0.000000e+00> : vector<80x128xf32>
    %10 = tpu.matmul %8, %9, %cst {dimension_numbers = #tpu.dot_dimension_numbers<[1], [0], [0], [1], [0, 0, 1, 1], [], []>} : vector<80x128xbf16>, vector<128x128xbf16>, vector<80x128xf32> -> vector<80x128xf32>
    %11 = vector.extract_strided_slice %10 {offsets = [0, 0], sizes = [16, 128], strides = [1, 1]} : vector<80x128xf32> to vector<16x128xf32>
    %12 = vector.extract_strided_slice %10 {offsets = [16, 0], sizes = [16, 128], strides = [1, 1]} : vector<80x128xf32> to vector<16x128xf32>
    %13 = vector.extract_strided_slice %10 {offsets = [32, 0], sizes = [16, 128], strides = [1, 1]} : vector<80x128xf32> to vector<16x128xf32>
    %14 = vector.extract_strided_slice %10 {offsets = [48, 0], sizes = [16, 128], strides = [1, 1]} : vector<80x128xf32> to vector<16x128xf32>
    %15 = vector.extract_strided_slice %10 {offsets = [64, 0], sizes = [16, 128], strides = [1, 1]} : vector<80x128xf32> to vector<16x128xf32>
    %16 = tpu.concatenate %11, %12, %13, %14, %15 in 1 : vector<16x128xf32>, vector<16x128xf32>, vector<16x128xf32>, vector<16x128xf32>, vector<16x128xf32> -> vector<16x640xf32>
    %c0_7 = arith.constant 0 : index
    %c0_8 = arith.constant 0 : index
    %17 = vector.load %arg3[%c0_7, %c0_8] : memref<16x16xbf16, #tpu.memory_space<vmem>>, vector<16x16xbf16>
    %18 = arith.truncf %16 : vector<16x640xf32> to vector<16x640xbf16>
    %cst_9 = arith.constant dense<0.000000e+00> : vector<16x640xf32>
    %19 = tpu.matmul %17, %18, %cst_9 {dimension_numbers = #tpu.dot_dimension_numbers<[1], [0], [0], [1], [0, 0, 1, 1], [], []>} : vector<16x16xbf16>, vector<16x640xbf16>, vector<16x640xf32> -> vector<16x640xf32>
    %20 = vector.extract_strided_slice %19 {offsets = [0, 0], sizes = [16, 128], strides = [1, 1]} : vector<16x640xf32> to vector<16x128xf32>
    %21 = vector.extract_strided_slice %19 {offsets = [0, 128], sizes = [16, 128], strides = [1, 1]} : vector<16x640xf32> to vector<16x128xf32>
    %22 = vector.extract_strided_slice %19 {offsets = [0, 256], sizes = [16, 128], strides = [1, 1]} : vector<16x640xf32> to vector<16x128xf32>
    %23 = vector.extract_strided_slice %19 {offsets = [0, 384], sizes = [16, 128], strides = [1, 1]} : vector<16x640xf32> to vector<16x128xf32>
    %24 = vector.extract_strided_slice %19 {offsets = [0, 512], sizes = [16, 128], strides = [1, 1]} : vector<16x640xf32> to vector<16x128xf32>
    %25 = arith.mulf %20, %20 : vector<16x128xf32>
    %26 = arith.mulf %21, %21 : vector<16x128xf32>
    %27 = arith.mulf %20, %21 : vector<16x128xf32>
    %28 = arith.subf %22, %25 : vector<16x128xf32>
    %29 = arith.subf %23, %26 : vector<16x128xf32>
    %30 = arith.subf %24, %27 : vector<16x128xf32>
    %cst_10 = arith.constant 2.000000e+00 : f32
    %31 = vector.broadcast %cst_10 : f32 to vector<16x128xf32>
    %32 = arith.mulf %31, %27 : vector<16x128xf32>
    %cst_11 = arith.constant 9.99999974E-5 : f32
    %33 = vector.broadcast %cst_11 : f32 to vector<16x128xf32>
    %34 = arith.addf %32, %33 : vector<16x128xf32>
    %cst_12 = arith.constant 2.000000e+00 : f32
    %35 = vector.broadcast %cst_12 : f32 to vector<16x128xf32>
    %36 = arith.mulf %35, %30 : vector<16x128xf32>
    %cst_13 = arith.constant 8.99999984E-4 : f32
    %37 = vector.broadcast %cst_13 : f32 to vector<16x128xf32>
    %38 = arith.addf %36, %37 : vector<16x128xf32>
    %39 = arith.mulf %34, %38 : vector<16x128xf32>
    %40 = arith.addf %25, %26 : vector<16x128xf32>
    %cst_14 = arith.constant 9.99999974E-5 : f32
    %41 = vector.broadcast %cst_14 : f32 to vector<16x128xf32>
    %42 = arith.addf %40, %41 : vector<16x128xf32>
    %43 = arith.addf %28, %29 : vector<16x128xf32>
    %cst_15 = arith.constant 8.99999984E-4 : f32
    %44 = vector.broadcast %cst_15 : f32 to vector<16x128xf32>
    %45 = arith.addf %43, %44 : vector<16x128xf32>
    %46 = arith.mulf %42, %45 : vector<16x128xf32>
    %47 = tpu.reciprocal %46 {approx = true} : vector<16x128xf32> -> vector<16x128xf32>
    %48 = arith.mulf %46, %47 : vector<16x128xf32>
    %cst_16 = arith.constant 2.000000e+00 : f32
    %49 = vector.broadcast %cst_16 : f32 to vector<16x128xf32>
    %50 = arith.subf %49, %48 : vector<16x128xf32>
    %51 = arith.mulf %47, %50 : vector<16x128xf32>
    %52 = arith.mulf %39, %51 : vector<16x128xf32>
    %cst_17 = arith.constant dense<0.000000e+00> : vector<128xf32>
    %53 = vector.multi_reduction <add>, %52, %cst_17 [0] : vector<16x128xf32> to vector<128xf32>
    %54 = vector.shape_cast %53 : vector<128xf32> to vector<1x128xf32>
    %c0_18 = arith.constant 0 : index
    %c0_19 = arith.constant 0 : index
    %55 = vector.load %arg5[%c0_18, %c0_19] : memref<128x8xf32, #tpu.memory_space<vmem>>, vector<128x8xf32>
    %cst_20 = arith.constant dense<0.000000e+00> : vector<1x8xf32>
    %56 = tpu.matmul %54, %55, %cst_20 {dimension_numbers = #tpu.dot_dimension_numbers<[1], [0], [0], [1], [0, 0, 1, 1], [], []>} : vector<1x128xf32>, vector<128x8xf32>, vector<1x8xf32> -> vector<1x8xf32>
    %57 = vector.shape_cast %56 : vector<1x8xf32> to vector<1x1x8xf32>
    %c0_21 = arith.constant 0 : index
    %c0_22 = arith.constant 0 : index
    %c0_23 = arith.constant 0 : index
    %58 = vector.load %arg6[%c0_21, %c0_22, %c0_23] : memref<1x1x8xf32, #tpu.memory_space<vmem>>, vector<1x1x8xf32>
    tpu.vector_store %arg6[%c0_21, %c0_22, %c0_23], %57 {strides = array<i32>} : memref<1x1x8xf32, #tpu.memory_space<vmem>>, vector<1x1x8xf32>,
    return
  }
  func.func @transform_0(%arg0: i32) -> (i32, i32, i32) {
    %c0_i32 = arith.constant 0 : i32
    %c0_i32_0 = arith.constant 0 : i32
    %c0_i32_1 = arith.constant 0 : i32
    return %arg0, %c0_i32, %c0_i32_0 : i32, i32, i32
  }
  func.func @transform_1(%arg0: i32) -> (i32, i32, i32) {
    %c0_i32 = arith.constant 0 : i32
    %c0_i32_0 = arith.constant 0 : i32
    %c0_i32_1 = arith.constant 0 : i32
    return %arg0, %c0_i32, %c0_i32_0 : i32, i32, i32
  }
  func.func @transform_2(%arg0: i32) -> (i32, i32) {
    %c0_i32 = arith.constant 0 : i32
    %c0_i32_0 = arith.constant 0 : i32
    %c0_i32_1 = arith.constant 0 : i32
    return %c0_i32, %c0_i32_0 : i32, i32
  }
  func.func @transform_3(%arg0: i32) -> (i32, i32) {
    %c0_i32 = arith.constant 0 : i32
    %c0_i32_0 = arith.constant 0 : i32
    %c0_i32_1 = arith.constant 0 : i32
    return %c0_i32, %c0_i32_0 : i32, i32
  }
  func.func @transform_4(%arg0: i32) -> (i32, i32) {
    %c0_i32 = arith.constant 0 : i32
    %c0_i32_0 = arith.constant 0 : i32
    %c0_i32_1 = arith.constant 0 : i32
    return %c0_i32, %c0_i32_0 : i32, i32
  }
  func.func @transform_5(%arg0: i32) -> (i32, i32, i32) {
    %c0_i32 = arith.constant 0 : i32
    %c0_i32_0 = arith.constant 0 : i32
    %c0_i32_1 = arith.constant 0 : i32
    return %arg0, %c0_i32, %c0_i32_0 : i32, i32, i32
  }
}

</mosaic_0001>

<bundles_post_ra>
// kernel: tpu_custom_call.1
= control target key start
LH: loop header
LB: loop body
LE: loop exit
PB: predicated region body
PF: predicated region fallthrough
CT: control target
= control target key end

     0   :  { %v628_v1 = vmov 0.0   ;;  %vm629_vm0 = vmmov 0   ;;  %s794_s0 = inlined_call_operand.vmem [shape: f32[1,16,128], index: 0, kind: input, shape index: {}]   ;;  %s795_s1 = inlined_call_operand.vmem [shape: f32[1,16,128], index: 1, kind: input, shape index: {}]   ;;  %s796_s2 = inlined_call_operand.vmem [shape: bf16[16,16], index: 2, kind: input, shape index: {}]   ;;  %s797_s3 = inlined_call_operand.vmem [shape: bf16[128,128], index: 3, kind: input, shape index: {}]   ;;  %s798_s4 = inlined_call_operand.vmem [shape: f32[128,8], index: 4, kind: input, shape index: {}]   ;;  %s799_s5 = inlined_call_operand.hbm [shape: f32[1,1,8], index: 5, kind: output, shape index: {}]  }
   0x1   :  { %v593_v0 = vld [vmem:[%s797_s3 + $0x38] sm:$0xff]   ;;  %512 = vmatprep.subr.bf16.mxu0 %v628_v1  ;;  %v594_v2 = vld [vmem:[%s797_s3 + $0x30] sm:$0xff]   ;;  %528 = vmatprep.mubr.msk.bf16.mxu0 %vm629_vm0, %v628_v1  ;;  %v595_v3 = vld [vmem:[%s797_s3 + $0x28] sm:$0xff]  }
   0x2   :  { %513 = vmatpush3.bf16.msra.mxu0 %v593_v0  ;;  %v596_v4 = vld [vmem:[%s797_s3 + $0x20] sm:$0xff]  }
   0x3   :  { %514 = vmatprep.subr.bf16.mxu0 %v628_v1 }
   0x6   :  { %515 = vmatpush3.bf16.msra.mxu0 %v594_v2 }
   0x7   :  { %516 = vmatprep.subr.bf16.mxu0 %v628_v1 }
   0xa   :  { %517 = vmatpush3.bf16.msra.mxu0 %v595_v3 }
   0xb   :  { %10 = vsyncpa [#allocation3], 0  ;;  %518 = vmatprep.subr.bf16.mxu0 %v628_v1  ;;  %v597_v5 = vld [vmem:[%s797_s3 + $0x18] sm:$0xff]   ;;  %v598_v6 = vld [vmem:[%s797_s3 + $0x10] sm:$0xff]   ;;  %v630_v24 = vmov 0   ;;  %vm186_vm1 = vcmask 130048  }
   0xc   :  { %v599_v7 = vld [vmem:[%s797_s3 + $0x8] sm:$0xff]   ;;  %v600_v8 = vld [vmem:[%s797_s3] sm:$0xff]   ;;  %222 = vmatprep.mubr.bf16.mxu1 %v630_v24  ;;  %v381_v51 = vld [vmem:[%s798_s4 + $0x78] sm:$0xff]  ;;  %vm452_vm2 = vcmask 57344  }
   0xd   :  { %v22_v9 = vld [vmem:[%s794_s0] sm:$0xff]  ;;  %v23_v10 = vld [vmem:[%s794_s0 + $0x8] sm:$0xff]  ;;  %v380_v52 = vld [vmem:[%s798_s4 + $0x70] sm:$0xff] }
   0xe   :  { %519 = vmatpush3.bf16.msra.mxu0 %v596_v4  ;;  %v32_v11 = vpack.c.bf16 %v23_v10, %v22_v9  ;;  %v24_v12 = vld [vmem:[%s795_s1] sm:$0xff]  ;;  %v25_v13 = vld [vmem:[%s795_s1 + $0x8] sm:$0xff]  ;;  %v26_v15 = vmul.f32 %v22_v9, %v22_v9  ;;  %v27_v16 = vmul.f32 %v23_v10, %v23_v10  ;;  %v377_v55 = vld [vmem:[%s798_s4 + $0x58] sm:$0xff] }
   0xf   :  { %520 = vmatprep.subr.bf16.mxu0 %v628_v1  ;;  %v33_v14 = vpack.c.bf16 %v25_v13, %v24_v12  ;;  %v28_v18 = vmul.f32 %v24_v12, %v24_v12  ;;  %v29_v19 = vmul.f32 %v25_v13, %v25_v13  ;;  %v30_v21 = vmul.f32 %v24_v12, %v22_v9  ;;  %v601_v35 = vld [vmem:[%s796_s2] sm:$0xff]   ;;  %v379_v53 = vld [vmem:[%s798_s4 + $0x68] sm:$0xff]  ;;  %v376_v56 = vld [vmem:[%s798_s4 + $0x50] sm:$0xff] }
  0x10   :  { %v34_v17 = vpack.c.bf16 %v27_v16, %v26_v15  ;;  %v31_v22 = vmul.f32 %v25_v13, %v23_v10  ;;  %v378_v54 = vld [vmem:[%s798_s4 + $0x60] sm:$0xff]  ;;  %v375_v57 = vld [vmem:[%s798_s4 + $0x48] sm:$0xff]  ;;  %v373_v59 = vld [vmem:[%s798_s4 + $0x38] sm:$0xff] }
  0x11   :  { %v35_v20 = vpack.c.bf16 %v29_v19, %v28_v18  ;;  %v374_v58 = vld [vmem:[%s798_s4 + $0x40] sm:$0xff]  ;;  %v372_v60 = vld [vmem:[%s798_s4 + $0x30] sm:$0xff]  ;;  %v371_v61 = vld [vmem:[%s798_s4 + $0x28] sm:$0xff] }
  0x12   :  { %521 = vmatpush3.bf16.msra.mxu0 %v597_v5  ;;  %v36_v23 = vpack.c.bf16 %v31_v22, %v30_v21  ;;  %v370_v62 = vld [vmem:[%s798_s4 + $0x20] sm:$0xff]  ;;  %v369_v63 = vld [vmem:[%s798_s4 + $0x18] sm:$0xff]  ;;  %v368_v0 = vld [vmem:[%s798_s4 + $0x10] sm:$0xff] }
  0x13   :  { %522 = vmatprep.subr.bf16.mxu0 %v628_v1  ;;  %v367_v2 = vld [vmem:[%s798_s4 + $0x8] sm:$0xff]  ;;  %v366_v3 = vld [vmem:[%s798_s4] sm:$0xff]  ;;  %s631_s4 = smov [#allocation2]  }
  0x14   :  { %s460_s18 = sshll.u32 %s631_s4, 4  ;;  %s461_s18 = int_to_ptr.vmem [resolvable:$true] %s460_s18 }
  0x15   :  { %s606_s19 = scalar_lea.vmem %s461_s18, 16  ;;  %s610_s20 = scalar_lea.vmem %s461_s18, 32 }
  0x16   :  { %523 = vmatpush3.bf16.msra.mxu0 %v598_v6  ;;  %p607_p0 = scmp.ne.s32.totalorder %s461_s18, %s606_s19  ;;  %p611_p1 = scmp.lt.s32.totalorder %s461_s18, %s461_s18 }
  0x17   :  { %524 = vmatprep.subr.bf16.mxu0 %v628_v1  ;;  %p612_p2 = scmp.lt.s32.totalorder %s610_s20, %s606_s19 }
  0x19   :  { %p613_p3 = por %p612_p2, %p611_p1 }
  0x1a   :  { %525 = vmatpush3.bf16.msra.mxu0 %v599_v7 }
  0x1b   :  { %526 = vmatprep.subr.bf16.mxu0 %v628_v1  ;;  %p614_p4 = pnand %p613_p3, %p607_p0 }
  0x1e   :  { %527 = vmatpush3.bf16.msra.mxu0 %v600_v8 }
  0x21   :  { %529 = vmatmul.mubr.bf16.vlgmr.msra.gmra.mxu0 %v32_v11 }
  0x22   :  { %532 = vmatprep.mubr.msk.bf16.mxu0 %vm629_vm0, %v628_v1 }
  0x29   :  { %533 = vmatmul.mubr.bf16.gmra.mxu0 %v33_v14 }
  0x2a   :  { %536 = vmatprep.mubr.msk.bf16.mxu0 %vm629_vm0, %v628_v1 }
  0x31   :  { %537 = vmatmul.mubr.bf16.gmra.mxu0 %v34_v17 }
  0x32   :  { %540 = vmatprep.mubr.msk.bf16.mxu0 %vm629_vm0, %v628_v1 }
  0x39   :  { %541 = vmatmul.mubr.bf16.gmra.mxu0 %v35_v20 }
  0x3a   :  { %544 = vmatprep.mubr.msk.bf16.mxu0 %vm629_vm0, %v628_v1 }
  0x41   :  { %545 = vmatmul.mubr.bf16.gmra.mxu0 %v36_v23 }
  0xe1   :  { %v135_v25 = vpop.f32.mrf.mxu0 }
  0xe3   :  { %v530_v26 = vpop.f32.mrf.mxu0 }
  0xe5   :  { %v138_v27 = vpop.f32.mrf.mxu0 }
  0xe6   :  { %v176_v33 = vpack.c.bf16 %v138_v27, %v135_v25 }
  0xe7   :  { %v531_v28 = vpop.f32.mrf.mxu0 }
  0xe9   :  { %v143_v29 = vpop.f32.mrf.mxu0 }
  0xeb   :  { %v534_v30 = vpop.f32.mrf.mxu0 }
  0xed   :  { %v146_v31 = vpop.f32.mrf.mxu0 }
  0xee   :  { %v177_v32 = vpack.c.bf16 %v146_v31, %v143_v29 }
  0xef   :  { %v535_v34 = vpop.f32.mrf.mxu0 }
  0xf0   :  { %204 = vmatprep.subr.bf16.mxu1 %v177_v32 }
  0xf1   :  { %v151_v36 = vpop.f32.mrf.mxu0  ;;  %205 = vmatpush1.bf16.msra.mxu1 %v176_v33 }
  0xf3   :  { %v538_v37 = vpop.f32.mrf.mxu0 }
  0xf4   :  { %477 = vmatmul.mubr.msk.bf16.vlgmr.msra.gmra.mxu1 %vm186_vm1, %v601_v35 }
  0xf5   :  { %v154_v38 = vpop.f32.mrf.mxu0  ;;  %265 = vmatprep.mubr.bf16.mxu1 %v630_v24 }
  0xf6   :  { %v178_v44 = vpack.c.bf16 %v154_v38, %v151_v36 }
  0xf7   :  { %v539_v39 = vpop.f32.mrf.mxu0 }
  0xf9   :  { %v159_v40 = vpop.f32.mrf.mxu0 }
  0xfb   :  { %v542_v41 = vpop.f32.mrf.mxu0 }
  0xfd   :  { %v162_v42 = vpop.f32.mrf.mxu0 }
  0xfe   :  { %v179_v43 = vpack.c.bf16 %v162_v42, %v159_v40 }
  0xff   :  { %v543_v45 = vpop.f32.mrf.mxu0 }
 0x100   :  { %247 = vmatprep.subr.bf16.mxu1 %v179_v43 }
 0x101   :  { %248 = vmatpush1.bf16.msra.mxu1 %v178_v44  ;;  %v167_v46 = vpop.f32.mrf.mxu0 }
 0x102   :  { %548 = vmatprep.subr.bf16.mxu1 %v628_v1 }
 0x103   :  { %v546_v47 = vpop.f32.mrf.mxu0 }
 0x104   :  { %478 = vmatmul.mubr.msk.bf16.vlgmr.msra.gmra.mxu1 %vm186_vm1, %v601_v35 }
 0x105   :  { %v170_v48 = vpop.f32.mrf.mxu0  ;;  %550 = vmatprep.mubr.msk.bf16.mxu1 %vm629_vm0, %v628_v1 }
 0x106   :  { %v180_v49 = vpack.c.bf16 %v170_v48, %v167_v46 }
 0x107   :  { %v547_v50 = vpop.f32.mrf.mxu0 }
 0x108   :  { %549 = vmatpush3.bf16.msra.mxu1 %v180_v49 }
 0x109   :  { %554 = vmatprep.subr.mxu1 %v628_v1 }
 0x10c   :  { %551 = vmatmul.mubr.msk.bf16.vlgmr.msra.gmra.mxu1 %vm186_vm1, %v601_v35 }
 0x10d   :  { %586 = vmatprep.mubr.msk.f32.mxu1 %vm629_vm0, %v628_v1  ;;  %555 = vmatpush3.msra.mxu1 %v381_v51 }
 0x10e   :  { %556 = vmatprep.subr.mxu1 %v628_v1 }
 0x10f   :  { %557 = vmatpush3.msra.mxu1 %v380_v52 }
 0x110   :  { %558 = vmatprep.subr.mxu1 %v628_v1 }
 0x111   :  { %559 = vmatpush3.msra.mxu1 %v379_v53 }
 0x112   :  { %560 = vmatprep.subr.mxu1 %v628_v1 }
 0x113   :  { %561 = vmatpush3.msra.mxu1 %v378_v54 }
 0x114   :  { %562 = vmatprep.subr.mxu1 %v628_v1 }
 0x115   :  { %563 = vmatpush3.msra.mxu1 %v377_v55 }
 0x116   :  { %564 = vmatprep.subr.mxu1 %v628_v1 }
 0x117   :  { %565 = vmatpush3.msra.mxu1 %v376_v56 }
 0x118   :  { %566 = vmatprep.subr.mxu1 %v628_v1 }
 0x119   :  { %567 = vmatpush3.msra.mxu1 %v375_v57 }
 0x11a   :  { %568 = vmatprep.subr.mxu1 %v628_v1 }
 0x11b   :  { %569 = vmatpush3.msra.mxu1 %v374_v58 }
 0x11c   :  { %570 = vmatprep.subr.mxu1 %v628_v1 }
 0x11d   :  { %571 = vmatpush3.msra.mxu1 %v373_v59 }
 0x11e   :  { %572 = vmatprep.subr.mxu1 %v628_v1 }
 0x11f   :  { %573 = vmatpush3.msra.mxu1 %v372_v60 }
 0x120   :  { %574 = vmatprep.subr.mxu1 %v628_v1 }
 0x121   :  { %575 = vmatpush3.msra.mxu1 %v371_v61 }
 0x122   :  { %576 = vmatprep.subr.mxu1 %v628_v1 }
 0x123   :  { %577 = vmatpush3.msra.mxu1 %v370_v62 }
 0x124   :  { %578 = vmatprep.subr.mxu1 %v628_v1 }
 0x125   :  { %579 = vmatpush3.msra.mxu1 %v369_v63 }
 0x126   :  { %580 = vmatprep.subr.mxu1 %v628_v1 }
 0x127   :  { %581 = vmatpush3.msra.mxu1 %v368_v0 }
 0x128   :  { %582 = vmatprep.subr.mxu1 %v628_v1 }
 0x129   :  { %583 = vmatpush3.msra.mxu1 %v367_v2 }
 0x12a   :  { %584 = vmatprep.subr.mxu1 %v628_v1 }
 0x12b   :  { %585 = vmatpush3.msra.mxu1 %v366_v3 }
 0x1b4   :  { %v224_v4 = vpop.f32.mrf.mxu1 }
 0x1b5   :  { %v317_v7 = vmul.f32 %v224_v4, %v224_v4 }
 0x1b6   :  { %v226_v5 = vpop.f32.mrf.mxu1 }
 0x1b7   :  { %v319_v8 = vmul.f32 %v226_v5, %v226_v5  ;;  %v321_v33 = vmul.f32 %v226_v5, %v224_v4 }
 0x1b8   :  { %v228_v6 = vpop.f32.mrf.mxu1 }
 0x1b9   :  { %v339_v11 = vadd.f32 %v319_v8, %v317_v7  ;;  %v318_v13 = vmul.f32 %v228_v6, %v228_v6  ;;  %v329_v41 = vmul.f32 2.0, %v321_v33 }
 0x1ba   :  { %v230_v9 = vpop.f32.mrf.mxu1 }
 0x1bb   :  { %v320_v14 = vmul.f32 %v230_v9, %v230_v9  ;;  %v341_v19 = vadd.f32 0.0001, %v339_v11  ;;  %v322_v34 = vmul.f32 %v230_v9, %v228_v6  ;;  %v331_v48 = vadd.f32 0.0001, %v329_v41 }
 0x1bd   :  { %v340_v21 = vadd.f32 %v320_v14, %v318_v13  ;;  %v330_v42 = vmul.f32 2.0, %v322_v34 }
 0x1bf   :  { %v342_v28 = vadd.f32 0.0001, %v340_v21  ;;  %v332_v49 = vadd.f32 0.0001, %v330_v42 }
 0x1c4   :  { %v267_v10 = vpop.f32.mrf.mxu1 }
 0x1c5   :  { %v323_v15 = vsub.f32 %v267_v10, %v317_v7 }
 0x1c6   :  { %v269_v12 = vpop.f32.mrf.mxu1 }
 0x1c7   :  { %v325_v16 = vsub.f32 %v269_v12, %v319_v8 }
 0x1c8   :  { %v271_v17 = vpop.f32.mrf.mxu1 }
 0x1c9   :  { %v343_v18 = vadd.f32 %v325_v16, %v323_v15  ;;  %v324_v22 = vsub.f32 %v271_v17, %v318_v13 }
 0x1ca   :  { %v273_v20 = vpop.f32.mrf.mxu1 }
 0x1cb   :  { %v345_v1 = vadd.f32 0.0009, %v343_v18  ;;  %v326_v23 = vsub.f32 %v273_v20, %v320_v14 }
 0x1cc   :  { %v310_v24 = vpop.f32.mrf.mxu1 }
 0x1cd   :  { %v347_v25 = vmul.f32 %v345_v1, %v341_v19  ;;  %v344_v26 = vadd.f32 %v326_v23, %v324_v22  ;;  %v327_v35 = vsub.f32 %v310_v24, %v321_v33 }
 0x1ce   :  { %v552_v27 = vpop.f32.mrf.mxu1 }
 0x1cf   :  { %602 = vrcp.f32 %v347_v25  ;;  %v346_v29 = vadd.f32 0.0009, %v344_v26  ;;  %v333_v39 = vmul.f32 2.0, %v327_v35 }
 0x1d0   :  { %v313_v30 = vpop.f32.mrf.mxu1 }
 0x1d1   :  { %v348_v31 = vmul.f32 %v346_v29, %v342_v28  ;;  %v328_v36 = vsub.f32 %v313_v30, %v322_v34  ;;  %v335_v46 = vadd.f32 0.0009, %v333_v39 }
 0x1d2   :  { %v553_v32 = vpop.f32.mrf.mxu1 }
 0x1d3   :  { %604 = vrcp.f32 %v348_v31  ;;  %v334_v40 = vmul.f32 2.0, %v328_v36  ;;  %v337_v52 = vmul.f32 %v335_v46, %v331_v48 }
 0x1d5   :  { %v336_v47 = vadd.f32 0.0009, %v334_v40 }
 0x1d7   :  { %v338_v53 = vmul.f32 %v336_v47, %v332_v49 }
 0x1dc   :  { %v603_v37 = vpop.eup %602 }
 0x1dd   :  { %v351_v38 = vmul.f32 %v603_v37, %v347_v25 }
 0x1df   :  { %v353_v43 = vsub.f32 2.0, %v351_v38 }
 0x1e0   :  { %v605_v44 = vpop.eup %604 }
 0x1e1   :  { %v352_v45 = vmul.f32 %v605_v44, %v348_v31  ;;  %v355_v51 = vmul.f32 %v603_v37, %v353_v43 }
 0x1e3   :  { %v354_v50 = vsub.f32 2.0, %v352_v45  ;;  %v357_v55 = vmul.f32 %v355_v51, %v337_v52 }
 0x1e5   :  { %v356_v54 = vmul.f32 %v605_v44, %v354_v50 }
 0x1e7   :  { %v358_v56 = vmul.f32 %v356_v54, %v338_v53 }
 0x1e9   :  { %v359_v57 = vadd.f32 %v358_v56, %v357_v55 }
 0x1eb   :  { %v360_v58 = vrot.slane %v359_v57, 4 }
 0x1ed   :  { %v361_v59 = vadd.f32 %v360_v58, %v359_v57 }
 0x1ef   :  { %v362_v60 = vrot.slane %v361_v59, 2 }
 0x1f1   :  { %v363_v61 = vadd.f32 %v362_v60, %v361_v59 }
 0x1f3   :  { %v364_v62 = vrot.slane %v363_v61, 1 }
 0x1f5   :  { %v365_v63 = vadd.f32 %v364_v62, %v363_v61 }
 0x1f7   :  { %587 = vmatmul.mubr.f32.vlgmr.msra.gmra.mxu1 %v365_v63 }
 0x2b7   :  { %v448_v0 = vpop.f32.mrf.mxu1 }
 0x2b8   :  { %453 = vst.msk [vmem:[#allocation2] sm:$0x1] %vm452_vm2, %v448_v0 }
 0x2b9   :  { %v588_v2 = vpop.f32.mrf.mxu1 }
 0x2ba   :  { %617 = shalt.err (!%p614_p4)
}
 0x2bb   :  { %463 = dma.vmem_to_hbm [thread:$0]  %s461_s18, 16, %s799_s5, [#allocation3]  }
 0x2bc   :  { %626 = dma.done.wait [#allocation3], 16  }
 0x2bd   :  { %627 = vsyncadd [#allocation3], 4294967280 }
 0x2be   :  { %467 = vsyncpa [#allocation3], 1 }

</bundles_post_ra>
